<compile_context>
chip_gen: v5e
topology: v5e:2x2
jax: 0.10.0
libtpu: 0.0.40
codegen_flags: <defaults>
</compile_context>

<pallas_src>
import functools
from typing import NamedTuple

import jax
import jax.numpy as jnp
from jax import lax
from jax.experimental import pallas as pl
from jax.experimental.pallas import tpu as pltpu


NEG_SLOPE = 0.2       # PyG GATConv default negative_slope
MASK_VAL = -1e9       # additive mask for non-edges (f32 only!)


def _ceil_to(v, m):
    return ((v + m - 1) // m) * m


class GATDims(NamedTuple):
    din: int
    heads: int
    d: int
    hd: int
    d2: int
    h1: int
    out_dim: int
    out_p: int
    r_w1: int
    r_w2: int
    r_w3: int
    r_w4: int
    r_as1: int
    r_ad1: int
    r_b1: int
    r_as2: int
    r_ad2: int
    r_b2: int
    r_b3: int
    r_b4: int


# ----------------------------------------------------------------------------
# Single fused kernel: GAT1 (all heads) + bias/ELU + GAT2 + bias + MLP head
# ----------------------------------------------------------------------------
def gat_fused_kernel(x_ref, adj_ref, w_ref, m_ref, o_ref, p_scr, xblk_scr, *,
                     dims):
    n = x_ref.shape[0]
    h, d, hd = dims.heads, dims.d, dims.hd
    d2, h1dim, out_p = dims.d2, dims.h1, dims.out_p

    # ---- unpack packed parameter slabs (static slices, cheap) ---------------
    w1 = w_ref[dims.r_w1:dims.r_w1 + dims.din, :hd]           # (din, hd)   bf16
    w2 = w_ref[dims.r_w2:dims.r_w2 + hd, :d2]                 # (hd, d2)    bf16
    w3 = w_ref[dims.r_w3:dims.r_w3 + d2, :h1dim]              # (d2, h1)    bf16
    w4 = w_ref[dims.r_w4:dims.r_w4 + h1dim, :out_p]           # (h1, out_p) bf16

    asrc1 = m_ref[dims.r_as1:dims.r_as1 + h, :hd]             # (h, hd) block rows
    adst1 = m_ref[dims.r_ad1:dims.r_ad1 + h, :hd]             # (h, hd) block rows
    b1 = m_ref[dims.r_b1:dims.r_b1 + 1, :hd]
    as2 = m_ref[dims.r_as2:dims.r_as2 + 1, :d2]
    ad2 = m_ref[dims.r_ad2:dims.r_ad2 + 1, :d2]
    b2 = m_ref[dims.r_b2:dims.r_b2 + 1, :d2]
    b3 = m_ref[dims.r_b3:dims.r_b3 + 1, :h1dim]
    b4 = m_ref[dims.r_b4:dims.r_b4 + 1, :out_p]

    # ---- additive edge mask (f32), computed in-kernel from int8 adjacency ----
    # Diagonal is always unmasked (PyG add_self_loops=True); this guarantees a
    # non-empty softmax row, so exp(e - m) underflow-to-zero masking is safe.
    row = lax.broadcasted_iota(jnp.int32, (n, n), 0)
    col = lax.broadcasted_iota(jnp.int32, (n, n), 1)
    keep = jnp.logical_or(adj_ref[...].astype(jnp.float32) > 0.0, row == col)
    mask_bias = jnp.where(keep, 0.0, MASK_VAL)

    # ---- GAT layer 1: all H heads, one lane-dense projection -----------------
    xh = jnp.dot(x_ref[...].astype(jnp.bfloat16), w1,
                 preferred_element_type=jnp.float32)           # (n, hd) f32
    # merged attention projections (block-structured matrices): two matmuls
    # for all heads; kept f32 so the softmax logits stay accurate.
    src_sc = lax.dot_general(asrc1, xh, (((1,), (1,)), ((), ())),
                             preferred_element_type=jnp.float32)   # (h, n)
    dst_sc = lax.dot_general(xh, adst1, (((1,), (1,)), ((), ())),
                             preferred_element_type=jnp.float32)   # (n, h)

    xh_b = xh.astype(jnp.bfloat16)
    xblk_scr[...] = jnp.zeros_like(xblk_scr)
    for k in range(h):                                         # static unroll
        # block-diagonal value matrix: rows k*n:(k+1)*n hold head k's features
        xblk_scr[k * n:(k + 1) * n, k * d:(k + 1) * d] = xh_b[:, k * d:(k + 1) * d]
        # e[i, j] = LeakyReLU(dst_i + src_j) + (0 | -1e9)
        e = dst_sc[:, k:k + 1] + src_sc[k:k + 1, :]            # (n, n) f32
        e = jnp.maximum(e, NEG_SLOPE * e) + mask_bias          # mul+max LeakyReLU
        m = jnp.max(e, axis=-1, keepdims=True)                 # diag => finite
        p = jnp.exp(e - m)                                     # masked -> exactly 0
        s = jnp.sum(p, axis=-1, keepdims=True)
        # exact reciprocal for the normalization; store lane-stacked per head
        p_scr[:, k * n:(k + 1) * n] = (p * (1.0 / s)).astype(jnp.bfloat16)

    # one lane-dense MXU aggregation for all heads -> (n, H*D)
    h1 = jnp.dot(p_scr[...], xblk_scr[...],
                 preferred_element_type=jnp.float32) + b1
    h1 = jnp.where(h1 > 0, h1, jnp.exp(h1) - 1.0)              # ELU (f32)

    # ---- GAT layer 2: single head, concat=False ------------------------------
    xh2 = jnp.dot(h1.astype(jnp.bfloat16), w2,
                  preferred_element_type=jnp.float32)           # (n, d2) f32
    src2 = lax.dot_general(as2, xh2, (((1,), (1,)), ((), ())),
                           preferred_element_type=jnp.float32)  # (1, n)
    dst2 = lax.dot_general(xh2, ad2, (((1,), (1,)), ((), ())),
                           preferred_element_type=jnp.float32)  # (n, 1)
    e2 = dst2 + src2
    e2 = jnp.maximum(e2, NEG_SLOPE * e2) + mask_bias
    m2 = jnp.max(e2, axis=-1, keepdims=True)
    p2 = jnp.exp(e2 - m2)
    s2 = jnp.sum(p2, axis=-1, keepdims=True)
    h2 = jnp.dot((p2 * (1.0 / s2)).astype(jnp.bfloat16), xh2.astype(jnp.bfloat16),
                 preferred_element_type=jnp.float32) + b2       # (n, d2)

    # ---- MLP head: ReLU -> Linear -> ReLU -> Linear (output lane-padded) -----
    hm = jnp.maximum(h2, 0.0)
    hm = jnp.maximum(jnp.dot(hm.astype(jnp.bfloat16), w3,
                             preferred_element_type=jnp.float32) + b3, 0.0)
    o_ref[...] = jnp.dot(hm.astype(jnp.bfloat16), w4,
                         preferred_element_type=jnp.float32) + b4


# ----------------------------------------------------------------------------
# One-time parameter / adjacency preparation (off the per-call hot path)
# ----------------------------------------------------------------------------
def prepare_params(params):
    """Repack the PyG-style parameter dict into two packed slabs:
    a bf16 matmul-weight slab and an f32 (attention vectors + biases) slab."""
    h, din, d = params["w1"].shape
    hd = h * d
    d2 = params["w2"].shape[2]
    h1 = params["w3"].shape[1]
    out_dim = params["w4"].shape[1]
    out_p = _ceil_to(max(out_dim, 128), 128)        # lane-dense final store
    lane_w = _ceil_to(max(hd, d2, h1, out_p), 128)

    # --- bf16 weight slab: row-stacked, offsets aligned to bf16 (16,128) tiles
    r_w1 = 0
    r_w2 = _ceil_to(r_w1 + din, 16)
    r_w3 = _ceil_to(r_w2 + hd, 16)
    r_w4 = _ceil_to(r_w3 + d2, 16)
    w_rows = _ceil_to(r_w4 + h1, 16)
    w_slab = jnp.zeros((w_rows, lane_w), jnp.float32)
    # heads fused on the lane axis: column block k*d:(k+1)*d == head k
    w1_all = jnp.transpose(params["w1"], (1, 0, 2)).reshape(din, hd)
    w_slab = w_slab.at[r_w1:r_w1 + din, :hd].set(w1_all)
    w_slab = w_slab.at[r_w2:r_w2 + hd, :d2].set(params["w2"][0])
    w_slab = w_slab.at[r_w3:r_w3 + d2, :h1].set(params["w3"])
    w_slab = w_slab.at[r_w4:r_w4 + h1, :out_dim].set(params["w4"])   # zero-padded
    w_slab = w_slab.astype(jnp.bfloat16)

    # --- f32 misc slab: block-structured attention projections + biases
    r_as1 = 0
    r_ad1 = _ceil_to(r_as1 + h, 8)
    r_b1 = _ceil_to(r_ad1 + h, 8)
    r_as2 = r_b1 + 8
    r_ad2 = r_as2 + 8
    r_b2 = r_ad2 + 8
    r_b3 = r_b2 + 8
    r_b4 = r_b3 + 8
    m_rows = r_b4 + 8
    m_slab = jnp.zeros((m_rows, lane_w), jnp.float32)
    for k in range(h):
        # row k holds head k's attention vector at lane block k*d:(k+1)*d so
        # all-head scores are two matmuls against the fused (n, hd) features.
        m_slab = m_slab.at[r_as1 + k, k * d:(k + 1) * d].set(params["att_src1"][k, 0])
        m_slab = m_slab.at[r_ad1 + k, k * d:(k + 1) * d].set(params["att_dst1"][k, 0])
    m_slab = m_slab.at[r_b1, :hd].set(params["bias1"])
    m_slab = m_slab.at[r_as2, :d2].set(params["att_src2"][0, 0])
    m_slab = m_slab.at[r_ad2, :d2].set(params["att_dst2"][0, 0])
    m_slab = m_slab.at[r_b2, :d2].set(params["bias2"])
    m_slab = m_slab.at[r_b3, :h1].set(params["b3"])
    m_slab = m_slab.at[r_b4, :out_dim].set(params["b4"])             # zero-padded

    dims = GATDims(din=din, heads=h, d=d, hd=hd, d2=d2, h1=h1,
                   out_dim=out_dim, out_p=out_p,
                   r_w1=r_w1, r_w2=r_w2, r_w3=r_w3, r_w4=r_w4,
                   r_as1=r_as1, r_ad1=r_ad1, r_b1=r_b1, r_as2=r_as2,
                   r_ad2=r_ad2, r_b2=r_b2, r_b3=r_b3, r_b4=r_b4)
    return {"w_slab": w_slab, "m_slab": m_slab, "dims": dims}


def prepare_adjacency(edge_index, num_nodes):
    """One-time: dense int8 adjacency, adj[i, j] = 1 iff edge j -> i (row =
    target node).  Self-loops need not be added here: the kernel always
    unmasks the diagonal (PyG GATConv add_self_loops=True)."""
    adj = jnp.zeros((num_nodes, num_nodes), jnp.int8)
    return adj.at[edge_index[1], edge_index[0]].set(1)


# ----------------------------------------------------------------------------
# Per-call hot path: a single pallas_call, no parameter repacking
# ----------------------------------------------------------------------------
def gat_classifier_forward(x, adj, packed):
    dims = packed["dims"]
    n = x.shape[0]
    kernel = functools.partial(gat_fused_kernel, dims=dims)
    out = pl.pallas_call(
        kernel,
        out_shape=jax.ShapeDtypeStruct((n, dims.out_p), jnp.float32),
        # No grid: single invocation, whole arrays in VMEM, no double-buffer
        # bookkeeping reserved for a one-step pipeline.
        in_specs=[pl.BlockSpec(memory_space=pltpu.MemorySpace.VMEM)] * 4,
        out_specs=pl.BlockSpec(memory_space=pltpu.MemorySpace.VMEM),
        scratch_shapes=[
            # lane-stacked normalized attention: column block k*n:(k+1)*n = head k
            pltpu.VMEM((n, dims.heads * n), jnp.bfloat16),
            # block-diagonal per-head value matrix
            pltpu.VMEM((dims.heads * n, dims.hd), jnp.bfloat16),
        ],
    )(x, adj, packed["w_slab"], packed["m_slab"])
    # TODO(synk): for large graphs, tile target-node row blocks on a
    # "parallel" grid axis with an online-softmax accumulator; re-derive the
    # row-tile size for v7x's 64 MiB VMEM (int8 adj tiles / smaller TN) and
    # its 2 TensorCores.
    return out[:, :dims.out_dim]


# ----------------------------------------------------------------------------
# Pure-JAX f32 reference (same dense GAT math) for a correctness check
# ----------------------------------------------------------------------------
def reference_forward(x, adj, params):
    def gat(xin, w, a_s, a_d, adjm):
        xh = jnp.einsum("nf,hfd->hnd", xin, w)
        asrc = jnp.einsum("hnd,hod->hn", xh, a_s)        # (H, N)
        adst = jnp.einsum("hnd,hod->hn", xh, a_d)
        e = adst[:, :, None] + asrc[:, None, :]
        e = jnp.where(e > 0, e, NEG_SLOPE * e)
        e = jnp.where(adjm[None] > 0, e, -1e30)
        e = e - jnp.max(e, axis=-1, keepdims=True)
        p = jnp.where(adjm[None] > 0, jnp.exp(e), 0.0)
        p = p / jnp.sum(p, axis=-1, keepdims=True)
        return jnp.einsum("hij,hjd->hid", p, xh)

    h1 = gat(x, params["w1"], params["att_src1"], params["att_dst1"], adj)
    H, N, D = h1.shape
    h1 = jnp.transpose(h1, (1, 0, 2)).reshape(N, H * D) + params["bias1"]
    h1 = jnp.where(h1 > 0, h1, jnp.exp(h1) - 1.0)
    h2 = gat(h1, params["w2"], params["att_src2"], params["att_dst2"], adj)[0] + params["bias2"]
    h = jnp.maximum(h2, 0.0)
    h = jnp.maximum(h @ params["w3"] + params["b3"], 0.0)
    return h @ params["w4"] + params["b4"]


def make_params(key, in_dim, hidden, heads, out_dim):
    ks = jax.random.split(key, 12)

    def glorot(k, shape, fan_in, fan_out):
        s = jnp.sqrt(6.0 / (fan_in + fan_out))
        return jax.random.uniform(k, shape, jnp.float32, -s, s)

    return {
        "w1": glorot(ks[0], (heads, in_dim, hidden), in_dim, heads * hidden),
        "att_src1": glorot(ks[1], (heads, 1, hidden), hidden, 1),
        "att_dst1": glorot(ks[2], (heads, 1, hidden), hidden, 1),
        "bias1": jnp.zeros((heads * hidden,), jnp.float32),
        "w2": glorot(ks[3], (1, heads * hidden, hidden), heads * hidden, hidden),
        "att_src2": glorot(ks[4], (1, 1, hidden), hidden, 1),
        "att_dst2": glorot(ks[5], (1, 1, hidden), hidden, 1),
        "bias2": jnp.zeros((hidden,), jnp.float32),
        "w3": glorot(ks[6], (hidden, 64), hidden, 64),
        "b3": jnp.zeros((64,), jnp.float32),
        "w4": glorot(ks[7], (64, out_dim), 64, out_dim),
        "b4": jnp.zeros((out_dim,), jnp.float32),
    }


if __name__ == "__main__":
    # Small shapes consistent with the module's forward (H*hidden = 128 lanes).
    N, IN_DIM, HIDDEN, HEADS, OUT_DIM = 16, 6, 32, 4, 3

    key = jax.random.PRNGKey(0)
    kx, kp = jax.random.split(key)
    x = jax.random.normal(kx, (N, IN_DIM), jnp.float32)

    # Deterministic small graph: ring (both directions) + chords of stride 5.
    idx = jnp.arange(N)
    src = jnp.concatenate([idx, (idx + 1) % N, idx]).astype(jnp.int32)
    dst = jnp.concatenate([(idx + 1) % N, idx, (idx + 5) % N]).astype(jnp.int32)
    edge_index = jnp.stack([src, dst])                      # [2, E] like PyG

    params = make_params(kp, IN_DIM, HIDDEN, HEADS, OUT_DIM)

    # One-time preparation (hoisted out of the per-call hot path).
    packed = prepare_params(params)
    adj_i8 = prepare_adjacency(edge_index, N)   # int8; kernel adds self-loops

    out = gat_classifier_forward(x, adj_i8, packed)
    out = jax.block_until_ready(out)

    # Reference uses an f32 adjacency WITH self-loops (PyG GATConv default).
    adj_ref = jnp.zeros((N, N), jnp.float32)
    adj_ref = adj_ref.at[edge_index[1], edge_index[0]].set(1.0)
    adj_ref = adj_ref.at[idx, idx].set(1.0)
    ref = reference_forward(x, adj_ref, params)

    assert out.shape == (N, OUT_DIM)
    # Tolerance accounts for bf16 MXU operands (f32 accumulation) vs the
    # full-f32 reference, compounded through two attention layers + MLP.
    assert jnp.allclose(out, ref, rtol=5e-2, atol=5e-2), "mismatch vs reference"

    print("KERNEL_OK")
</pallas_src>

<mosaic_0001>
module attributes {stable_mosaic.version = 11 : i64} {
  func.func @gat_fused_kernel(%arg0: memref<16x6xf32, #tpu.memory_space<vmem>>, %arg1: memref<16x16xi8, #tpu.memory_space<vmem>>, %arg2: memref<240x128xbf16, #tpu.memory_space<vmem>>, %arg3: memref<64x128xf32, #tpu.memory_space<vmem>>, %arg4: memref<16x128xf32, #tpu.memory_space<vmem>>, %arg5: memref<16x64xbf16, #tpu.memory_space<vmem>>, %arg6: memref<64x128xbf16, #tpu.memory_space<vmem>>) attributes {dimension_semantics = [], scalar_prefetch = 0 : i64, scratch_operands = 2 : i64, tpu.core_type = #tpu.core_type<tc>} {
    %c0 = arith.constant 0 : index
    %c0_0 = arith.constant 0 : index
    %0 = vector.load %arg2[%c0, %c0_0] : memref<240x128xbf16, #tpu.memory_space<vmem>>, vector<6x128xbf16>
    %c16 = arith.constant 16 : index
    %c0_1 = arith.constant 0 : index
    %1 = vector.load %arg2[%c16, %c0_1] : memref<240x128xbf16, #tpu.memory_space<vmem>>, vector<128x32xbf16>
    %c144 = arith.constant 144 : index
    %c0_2 = arith.constant 0 : index
    %2 = vector.load %arg2[%c144, %c0_2] : memref<240x128xbf16, #tpu.memory_space<vmem>>, vector<32x64xbf16>
    %c176 = arith.constant 176 : index
    %c0_3 = arith.constant 0 : index
    %3 = vector.load %arg2[%c176, %c0_3] : memref<240x128xbf16, #tpu.memory_space<vmem>>, vector<64x128xbf16>
    %c0_4 = arith.constant 0 : index
    %c0_5 = arith.constant 0 : index
    %4 = vector.load %arg3[%c0_4, %c0_5] : memref<64x128xf32, #tpu.memory_space<vmem>>, vector<4x128xf32>
    %c8 = arith.constant 8 : index
    %c0_6 = arith.constant 0 : index
    %5 = vector.load %arg3[%c8, %c0_6] : memref<64x128xf32, #tpu.memory_space<vmem>>, vector<4x128xf32>
    %c16_7 = arith.constant 16 : index
    %c0_8 = arith.constant 0 : index
    %6 = vector.load %arg3[%c16_7, %c0_8] : memref<64x128xf32, #tpu.memory_space<vmem>>, vector<1x128xf32>
    %c24 = arith.constant 24 : index
    %c0_9 = arith.constant 0 : index
    %7 = vector.load %arg3[%c24, %c0_9] : memref<64x128xf32, #tpu.memory_space<vmem>>, vector<1x32xf32>
    %c32 = arith.constant 32 : index
    %c0_10 = arith.constant 0 : index
    %8 = vector.load %arg3[%c32, %c0_10] : memref<64x128xf32, #tpu.memory_space<vmem>>, vector<1x32xf32>
    %c40 = arith.constant 40 : index
    %c0_11 = arith.constant 0 : index
    %9 = vector.load %arg3[%c40, %c0_11] : memref<64x128xf32, #tpu.memory_space<vmem>>, vector<1x32xf32>
    %c48 = arith.constant 48 : index
    %c0_12 = arith.constant 0 : index
    %10 = vector.load %arg3[%c48, %c0_12] : memref<64x128xf32, #tpu.memory_space<vmem>>, vector<1x64xf32>
    %c56 = arith.constant 56 : index
    %c0_13 = arith.constant 0 : index
    %11 = vector.load %arg3[%c56, %c0_13] : memref<64x128xf32, #tpu.memory_space<vmem>>, vector<1x128xf32>
    %12 = tpu.iota {dimensions = array<i32: 0>} : vector<16x16xi32>
    %13 = tpu.iota {dimensions = array<i32: 1>} : vector<16x16xi32>
    %c0_14 = arith.constant 0 : index
    %c0_15 = arith.constant 0 : index
    %14 = vector.load %arg1[%c0_14, %c0_15] : memref<16x16xi8, #tpu.memory_space<vmem>>, vector<16x16xi8>
    %15 = arith.sitofp %14 : vector<16x16xi8> to vector<16x16xf32>
    %cst = arith.constant 0.000000e+00 : f32
    %16 = vector.broadcast %cst : f32 to vector<16x16xf32>
    %17 = arith.cmpf ogt, %15, %16 : vector<16x16xf32>
    %18 = arith.cmpi eq, %12, %13 : vector<16x16xi32>
    %19 = arith.ori %17, %18 : vector<16x16xi1>
    %cst_16 = arith.constant 0.000000e+00 : f32
    %cst_17 = arith.constant -1.000000e+09 : f32
    %20 = vector.broadcast %cst_16 : f32 to vector<16x16xf32>
    %21 = vector.broadcast %cst_17 : f32 to vector<16x16xf32>
    %22 = arith.select %19, %20, %21 : vector<16x16xi1>, vector<16x16xf32>
    %c0_18 = arith.constant 0 : index
    %c0_19 = arith.constant 0 : index
    %23 = vector.load %arg0[%c0_18, %c0_19] : memref<16x6xf32, #tpu.memory_space<vmem>>, vector<16x6xf32>
    %24 = arith.truncf %23 : vector<16x6xf32> to vector<16x6xbf16>
    %cst_20 = arith.constant dense<0.000000e+00> : vector<16x128xf32>
    %25 = tpu.matmul %24, %0, %cst_20 {dimension_numbers = #tpu.dot_dimension_numbers<[1], [0], [0], [1], [0, 0, 1, 1], [], []>} : vector<16x6xbf16>, vector<6x128xbf16>, vector<16x128xf32> -> vector<16x128xf32>
    %cst_21 = arith.constant dense<0.000000e+00> : vector<4x16xf32>
    %26 = tpu.matmul %4, %25, %cst_21 {dimension_numbers = #tpu.dot_dimension_numbers<[1], [1], [0], [0], [0, 0, 1, 0], [], []>} : vector<4x128xf32>, vector<16x128xf32>, vector<4x16xf32> -> vector<4x16xf32>
    %cst_22 = arith.constant dense<0.000000e+00> : vector<16x4xf32>
    %27 = tpu.matmul %25, %5, %cst_22 {dimension_numbers = #tpu.dot_dimension_numbers<[1], [1], [0], [0], [0, 0, 1, 0], [], []>} : vector<16x128xf32>, vector<4x128xf32>, vector<16x4xf32> -> vector<16x4xf32>
    %28 = arith.truncf %25 : vector<16x128xf32> to vector<16x128xbf16>
    %cst_23 = arith.constant 0.000000e+00 : bf16
    %29 = vector.broadcast %cst_23 : bf16 to vector<64x128xbf16>
    %c0_24 = arith.constant 0 : index
    %c0_25 = arith.constant 0 : index
    %30 = vector.load %arg6[%c0_24, %c0_25] : memref<64x128xbf16, #tpu.memory_space<vmem>>, vector<64x128xbf16>
    tpu.vector_store %arg6[%c0_24, %c0_25], %29 {strides = array<i32>} : memref<64x128xbf16, #tpu.memory_space<vmem>>, vector<64x128xbf16>,
    %31 = vector.extract_strided_slice %28 {offsets = [0, 0], sizes = [16, 32], strides = [1, 1]} : vector<16x128xbf16> to vector<16x32xbf16>
    %c0_26 = arith.constant 0 : index
    %c0_27 = arith.constant 0 : index
    %32 = vector.load %arg6[%c0_26, %c0_27] : memref<64x128xbf16, #tpu.memory_space<vmem>>, vector<16x32xbf16>
    tpu.vector_store %arg6[%c0_26, %c0_27], %31 {strides = array<i32>} : memref<64x128xbf16, #tpu.memory_space<vmem>>, vector<16x32xbf16>,
    %33 = vector.extract_strided_slice %27 {offsets = [0, 0], sizes = [16, 1], strides = [1, 1]} : vector<16x4xf32> to vector<16x1xf32>
    %34 = vector.extract_strided_slice %26 {offsets = [0, 0], sizes = [1, 16], strides = [1, 1]} : vector<4x16xf32> to vector<1x16xf32>
    %35 = vector.broadcast %33 : vector<16x1xf32> to vector<16x16xf32>
    %36 = vector.broadcast %34 : vector<1x16xf32> to vector<16x16xf32>
    %37 = arith.addf %35, %36 : vector<16x16xf32>
    %cst_28 = arith.constant 2.000000e-01 : f32
    %38 = vector.broadcast %cst_28 : f32 to vector<16x16xf32>
    %39 = arith.mulf %38, %37 : vector<16x16xf32>
    %40 = arith.maximumf %37, %39 : vector<16x16xf32>
    %41 = arith.addf %40, %22 : vector<16x16xf32>
    %cst_29 = arith.constant dense<0xFF800000> : vector<16xf32>
    %42 = vector.multi_reduction <maximumf>, %41, %cst_29 [1] : vector<16x16xf32> to vector<16xf32>
    %43 = vector.shape_cast %42 : vector<16xf32> to vector<16x1xf32>
    %44 = vector.broadcast %43 : vector<16x1xf32> to vector<16x16xf32>
    %45 = arith.subf %41, %44 : vector<16x16xf32>
    %46 = math.exp %45 : vector<16x16xf32>
    %cst_30 = arith.constant dense<0.000000e+00> : vector<16xf32>
    %47 = vector.multi_reduction <add>, %46, %cst_30 [1] : vector<16x16xf32> to vector<16xf32>
    %48 = vector.shape_cast %47 : vector<16xf32> to vector<16x1xf32>
    %cst_31 = arith.constant 1.000000e+00 : f32
    %49 = vector.broadcast %cst_31 : f32 to vector<16x1xf32>
    %50 = arith.divf %49, %48 : vector<16x1xf32>
    %51 = vector.broadcast %50 : vector<16x1xf32> to vector<16x16xf32>
    %52 = arith.mulf %46, %51 : vector<16x16xf32>
    %53 = arith.truncf %52 : vector<16x16xf32> to vector<16x16xbf16>
    %c0_32 = arith.constant 0 : index
    %c0_33 = arith.constant 0 : index
    %54 = vector.load %arg5[%c0_32, %c0_33] : memref<16x64xbf16, #tpu.memory_space<vmem>>, vector<16x16xbf16>
    tpu.vector_store %arg5[%c0_32, %c0_33], %53 {strides = array<i32>} : memref<16x64xbf16, #tpu.memory_space<vmem>>, vector<16x16xbf16>,
    %55 = vector.extract_strided_slice %28 {offsets = [0, 32], sizes = [16, 32], strides = [1, 1]} : vector<16x128xbf16> to vector<16x32xbf16>
    %c16_34 = arith.constant 16 : index
    %c32_35 = arith.constant 32 : index
    %56 = vector.load %arg6[%c16_34, %c32_35] : memref<64x128xbf16, #tpu.memory_space<vmem>>, vector<16x32xbf16>
    tpu.vector_store %arg6[%c16_34, %c32_35], %55 {strides = array<i32>} : memref<64x128xbf16, #tpu.memory_space<vmem>>, vector<16x32xbf16>,
    %57 = vector.extract_strided_slice %27 {offsets = [0, 1], sizes = [16, 1], strides = [1, 1]} : vector<16x4xf32> to vector<16x1xf32>
    %58 = vector.extract_strided_slice %26 {offsets = [1, 0], sizes = [1, 16], strides = [1, 1]} : vector<4x16xf32> to vector<1x16xf32>
    %59 = vector.broadcast %57 : vector<16x1xf32> to vector<16x16xf32>
    %60 = vector.broadcast %58 : vector<1x16xf32> to vector<16x16xf32>
    %61 = arith.addf %59, %60 : vector<16x16xf32>
    %cst_36 = arith.constant 2.000000e-01 : f32
    %62 = vector.broadcast %cst_36 : f32 to vector<16x16xf32>
    %63 = arith.mulf %62, %61 : vector<16x16xf32>
    %64 = arith.maximumf %61, %63 : vector<16x16xf32>
    %65 = arith.addf %64, %22 : vector<16x16xf32>
    %cst_37 = arith.constant dense<0xFF800000> : vector<16xf32>
    %66 = vector.multi_reduction <maximumf>, %65, %cst_37 [1] : vector<16x16xf32> to vector<16xf32>
    %67 = vector.shape_cast %66 : vector<16xf32> to vector<16x1xf32>
    %68 = vector.broadcast %67 : vector<16x1xf32> to vector<16x16xf32>
    %69 = arith.subf %65, %68 : vector<16x16xf32>
    %70 = math.exp %69 : vector<16x16xf32>
    %cst_38 = arith.constant dense<0.000000e+00> : vector<16xf32>
    %71 = vector.multi_reduction <add>, %70, %cst_38 [1] : vector<16x16xf32> to vector<16xf32>
    %72 = vector.shape_cast %71 : vector<16xf32> to vector<16x1xf32>
    %cst_39 = arith.constant 1.000000e+00 : f32
    %73 = vector.broadcast %cst_39 : f32 to vector<16x1xf32>
    %74 = arith.divf %73, %72 : vector<16x1xf32>
    %75 = vector.broadcast %74 : vector<16x1xf32> to vector<16x16xf32>
    %76 = arith.mulf %70, %75 : vector<16x16xf32>
    %77 = arith.truncf %76 : vector<16x16xf32> to vector<16x16xbf16>
    %c0_40 = arith.constant 0 : index
    %c16_41 = arith.constant 16 : index
    %78 = vector.load %arg5[%c0_40, %c16_41] : memref<16x64xbf16, #tpu.memory_space<vmem>>, vector<16x16xbf16>
    tpu.vector_store %arg5[%c0_40, %c16_41], %77 {strides = array<i32>} : memref<16x64xbf16, #tpu.memory_space<vmem>>, vector<16x16xbf16>,
    %79 = vector.extract_strided_slice %28 {offsets = [0, 64], sizes = [16, 32], strides = [1, 1]} : vector<16x128xbf16> to vector<16x32xbf16>
    %c32_42 = arith.constant 32 : index
    %c64 = arith.constant 64 : index
    %80 = vector.load %arg6[%c32_42, %c64] : memref<64x128xbf16, #tpu.memory_space<vmem>>, vector<16x32xbf16>
    tpu.vector_store %arg6[%c32_42, %c64], %79 {strides = array<i32>} : memref<64x128xbf16, #tpu.memory_space<vmem>>, vector<16x32xbf16>,
    %81 = vector.extract_strided_slice %27 {offsets = [0, 2], sizes = [16, 1], strides = [1, 1]} : vector<16x4xf32> to vector<16x1xf32>
    %82 = vector.extract_strided_slice %26 {offsets = [2, 0], sizes = [1, 16], strides = [1, 1]} : vector<4x16xf32> to vector<1x16xf32>
    %83 = vector.broadcast %81 : vector<16x1xf32> to vector<16x16xf32>
    %84 = vector.broadcast %82 : vector<1x16xf32> to vector<16x16xf32>
    %85 = arith.addf %83, %84 : vector<16x16xf32>
    %cst_43 = arith.constant 2.000000e-01 : f32
    %86 = vector.broadcast %cst_43 : f32 to vector<16x16xf32>
    %87 = arith.mulf %86, %85 : vector<16x16xf32>
    %88 = arith.maximumf %85, %87 : vector<16x16xf32>
    %89 = arith.addf %88, %22 : vector<16x16xf32>
    %cst_44 = arith.constant dense<0xFF800000> : vector<16xf32>
    %90 = vector.multi_reduction <maximumf>, %89, %cst_44 [1] : vector<16x16xf32> to vector<16xf32>
    %91 = vector.shape_cast %90 : vector<16xf32> to vector<16x1xf32>
    %92 = vector.broadcast %91 : vector<16x1xf32> to vector<16x16xf32>
    %93 = arith.subf %89, %92 : vector<16x16xf32>
    %94 = math.exp %93 : vector<16x16xf32>
    %cst_45 = arith.constant dense<0.000000e+00> : vector<16xf32>
    %95 = vector.multi_reduction <add>, %94, %cst_45 [1] : vector<16x16xf32> to vector<16xf32>
    %96 = vector.shape_cast %95 : vector<16xf32> to vector<16x1xf32>
    %cst_46 = arith.constant 1.000000e+00 : f32
    %97 = vector.broadcast %cst_46 : f32 to vector<16x1xf32>
    %98 = arith.divf %97, %96 : vector<16x1xf32>
    %99 = vector.broadcast %98 : vector<16x1xf32> to vector<16x16xf32>
    %100 = arith.mulf %94, %99 : vector<16x16xf32>
    %101 = arith.truncf %100 : vector<16x16xf32> to vector<16x16xbf16>
    %c0_47 = arith.constant 0 : index
    %c32_48 = arith.constant 32 : index
    %102 = vector.load %arg5[%c0_47, %c32_48] : memref<16x64xbf16, #tpu.memory_space<vmem>>, vector<16x16xbf16>
    tpu.vector_store %arg5[%c0_47, %c32_48], %101 {strides = array<i32>} : memref<16x64xbf16, #tpu.memory_space<vmem>>, vector<16x16xbf16>,
    %103 = vector.extract_strided_slice %28 {offsets = [0, 96], sizes = [16, 32], strides = [1, 1]} : vector<16x128xbf16> to vector<16x32xbf16>
    %c48_49 = arith.constant 48 : index
    %c96 = arith.constant 96 : index
    %104 = vector.load %arg6[%c48_49, %c96] : memref<64x128xbf16, #tpu.memory_space<vmem>>, vector<16x32xbf16>
    tpu.vector_store %arg6[%c48_49, %c96], %103 {strides = array<i32>} : memref<64x128xbf16, #tpu.memory_space<vmem>>, vector<16x32xbf16>,
    %105 = vector.extract_strided_slice %27 {offsets = [0, 3], sizes = [16, 1], strides = [1, 1]} : vector<16x4xf32> to vector<16x1xf32>
    %106 = vector.extract_strided_slice %26 {offsets = [3, 0], sizes = [1, 16], strides = [1, 1]} : vector<4x16xf32> to vector<1x16xf32>
    %107 = vector.broadcast %105 : vector<16x1xf32> to vector<16x16xf32>
    %108 = vector.broadcast %106 : vector<1x16xf32> to vector<16x16xf32>
    %109 = arith.addf %107, %108 : vector<16x16xf32>
    %cst_50 = arith.constant 2.000000e-01 : f32
    %110 = vector.broadcast %cst_50 : f32 to vector<16x16xf32>
    %111 = arith.mulf %110, %109 : vector<16x16xf32>
    %112 = arith.maximumf %109, %111 : vector<16x16xf32>
    %113 = arith.addf %112, %22 : vector<16x16xf32>
    %cst_51 = arith.constant dense<0xFF800000> : vector<16xf32>
    %114 = vector.multi_reduction <maximumf>, %113, %cst_51 [1] : vector<16x16xf32> to vector<16xf32>
    %115 = vector.shape_cast %114 : vector<16xf32> to vector<16x1xf32>
    %116 = vector.broadcast %115 : vector<16x1xf32> to vector<16x16xf32>
    %117 = arith.subf %113, %116 : vector<16x16xf32>
    %118 = math.exp %117 : vector<16x16xf32>
    %cst_52 = arith.constant dense<0.000000e+00> : vector<16xf32>
    %119 = vector.multi_reduction <add>, %118, %cst_52 [1] : vector<16x16xf32> to vector<16xf32>
    %120 = vector.shape_cast %119 : vector<16xf32> to vector<16x1xf32>
    %cst_53 = arith.constant 1.000000e+00 : f32
    %121 = vector.broadcast %cst_53 : f32 to vector<16x1xf32>
    %122 = arith.divf %121, %120 : vector<16x1xf32>
    %123 = vector.broadcast %122 : vector<16x1xf32> to vector<16x16xf32>
    %124 = arith.mulf %118, %123 : vector<16x16xf32>
    %125 = arith.truncf %124 : vector<16x16xf32> to vector<16x16xbf16>
    %c0_54 = arith.constant 0 : index
    %c48_55 = arith.constant 48 : index
    %126 = vector.load %arg5[%c0_54, %c48_55] : memref<16x64xbf16, #tpu.memory_space<vmem>>, vector<16x16xbf16>
    tpu.vector_store %arg5[%c0_54, %c48_55], %125 {strides = array<i32>} : memref<16x64xbf16, #tpu.memory_space<vmem>>, vector<16x16xbf16>,
    %c0_56 = arith.constant 0 : index
    %c0_57 = arith.constant 0 : index
    %127 = vector.load %arg5[%c0_56, %c0_57] : memref<16x64xbf16, #tpu.memory_space<vmem>>, vector<16x64xbf16>
    %c0_58 = arith.constant 0 : index
    %c0_59 = arith.constant 0 : index
    %128 = vector.load %arg6[%c0_58, %c0_59] : memref<64x128xbf16, #tpu.memory_space<vmem>>, vector<64x128xbf16>
    %cst_60 = arith.constant dense<0.000000e+00> : vector<16x128xf32>
    %129 = tpu.matmul %127, %128, %cst_60 {dimension_numbers = #tpu.dot_dimension_numbers<[1], [0], [0], [1], [0, 0, 1, 1], [], []>} : vector<16x64xbf16>, vector<64x128xbf16>, vector<16x128xf32> -> vector<16x128xf32>
    %130 = vector.broadcast %6 : vector<1x128xf32> to vector<16x128xf32>
    %131 = arith.addf %129, %130 : vector<16x128xf32>
    %cst_61 = arith.constant 0.000000e+00 : f32
    %132 = vector.broadcast %cst_61 : f32 to vector<16x128xf32>
    %133 = arith.cmpf ogt, %131, %132 : vector<16x128xf32>
    %134 = math.exp %131 : vector<16x128xf32>
    %cst_62 = arith.constant 1.000000e+00 : f32
    %135 = vector.broadcast %cst_62 : f32 to vector<16x128xf32>
    %136 = arith.subf %134, %135 : vector<16x128xf32>
    %137 = arith.select %133, %131, %136 : vector<16x128xi1>, vector<16x128xf32>
    %138 = arith.truncf %137 : vector<16x128xf32> to vector<16x128xbf16>
    %cst_63 = arith.constant dense<0.000000e+00> : vector<16x32xf32>
    %139 = tpu.matmul %138, %1, %cst_63 {dimension_numbers = #tpu.dot_dimension_numbers<[1], [0], [0], [1], [0, 0, 1, 1], [], []>} : vector<16x128xbf16>, vector<128x32xbf16>, vector<16x32xf32> -> vector<16x32xf32>
    %cst_64 = arith.constant dense<0.000000e+00> : vector<1x16xf32>
    %140 = tpu.matmul %7, %139, %cst_64 {dimension_numbers = #tpu.dot_dimension_numbers<[1], [1], [0], [0], [0, 0, 1, 0], [], []>} : vector<1x32xf32>, vector<16x32xf32>, vector<1x16xf32> -> vector<1x16xf32>
    %cst_65 = arith.constant dense<0.000000e+00> : vector<16x1xf32>
    %141 = tpu.matmul %139, %8, %cst_65 {dimension_numbers = #tpu.dot_dimension_numbers<[1], [1], [0], [0], [0, 0, 1, 0], [], []>} : vector<16x32xf32>, vector<1x32xf32>, vector<16x1xf32> -> vector<16x1xf32>
    %142 = vector.broadcast %141 : vector<16x1xf32> to vector<16x16xf32>
    %143 = vector.broadcast %140 : vector<1x16xf32> to vector<16x16xf32>
    %144 = arith.addf %142, %143 : vector<16x16xf32>
    %cst_66 = arith.constant 2.000000e-01 : f32
    %145 = vector.broadcast %cst_66 : f32 to vector<16x16xf32>
    %146 = arith.mulf %145, %144 : vector<16x16xf32>
    %147 = arith.maximumf %144, %146 : vector<16x16xf32>
    %148 = arith.addf %147, %22 : vector<16x16xf32>
    %cst_67 = arith.constant dense<0xFF800000> : vector<16xf32>
    %149 = vector.multi_reduction <maximumf>, %148, %cst_67 [1] : vector<16x16xf32> to vector<16xf32>
    %150 = vector.shape_cast %149 : vector<16xf32> to vector<16x1xf32>
    %151 = vector.broadcast %150 : vector<16x1xf32> to vector<16x16xf32>
    %152 = arith.subf %148, %151 : vector<16x16xf32>
    %153 = math.exp %152 : vector<16x16xf32>
    %cst_68 = arith.constant dense<0.000000e+00> : vector<16xf32>
    %154 = vector.multi_reduction <add>, %153, %cst_68 [1] : vector<16x16xf32> to vector<16xf32>
    %155 = vector.shape_cast %154 : vector<16xf32> to vector<16x1xf32>
    %cst_69 = arith.constant 1.000000e+00 : f32
    %156 = vector.broadcast %cst_69 : f32 to vector<16x1xf32>
    %157 = arith.divf %156, %155 : vector<16x1xf32>
    %158 = vector.broadcast %157 : vector<16x1xf32> to vector<16x16xf32>
    %159 = arith.mulf %153, %158 : vector<16x16xf32>
    %160 = arith.truncf %159 : vector<16x16xf32> to vector<16x16xbf16>
    %161 = arith.truncf %139 : vector<16x32xf32> to vector<16x32xbf16>
    %cst_70 = arith.constant dense<0.000000e+00> : vector<16x32xf32>
    %162 = tpu.matmul %160, %161, %cst_70 {dimension_numbers = #tpu.dot_dimension_numbers<[1], [0], [0], [1], [0, 0, 1, 1], [], []>} : vector<16x16xbf16>, vector<16x32xbf16>, vector<16x32xf32> -> vector<16x32xf32>
    %163 = vector.broadcast %9 : vector<1x32xf32> to vector<16x32xf32>
    %164 = arith.addf %162, %163 : vector<16x32xf32>
    %cst_71 = arith.constant 0.000000e+00 : f32
    %165 = vector.broadcast %cst_71 : f32 to vector<16x32xf32>
    %166 = arith.maximumf %164, %165 : vector<16x32xf32>
    %167 = arith.truncf %166 : vector<16x32xf32> to vector<16x32xbf16>
    %cst_72 = arith.constant dense<0.000000e+00> : vector<16x64xf32>
    %168 = tpu.matmul %167, %2, %cst_72 {dimension_numbers = #tpu.dot_dimension_numbers<[1], [0], [0], [1], [0, 0, 1, 1], [], []>} : vector<16x32xbf16>, vector<32x64xbf16>, vector<16x64xf32> -> vector<16x64xf32>
    %169 = vector.broadcast %10 : vector<1x64xf32> to vector<16x64xf32>
    %170 = arith.addf %168, %169 : vector<16x64xf32>
    %cst_73 = arith.constant 0.000000e+00 : f32
    %171 = vector.broadcast %cst_73 : f32 to vector<16x64xf32>
    %172 = arith.maximumf %170, %171 : vector<16x64xf32>
    %173 = arith.truncf %172 : vector<16x64xf32> to vector<16x64xbf16>
    %cst_74 = arith.constant dense<0.000000e+00> : vector<16x128xf32>
    %174 = tpu.matmul %173, %3, %cst_74 {dimension_numbers = #tpu.dot_dimension_numbers<[1], [0], [0], [1], [0, 0, 1, 1], [], []>} : vector<16x64xbf16>, vector<64x128xbf16>, vector<16x128xf32> -> vector<16x128xf32>
    %175 = vector.broadcast %11 : vector<1x128xf32> to vector<16x128xf32>
    %176 = arith.addf %174, %175 : vector<16x128xf32>
    %c0_75 = arith.constant 0 : index
    %c0_76 = arith.constant 0 : index
    %177 = vector.load %arg4[%c0_75, %c0_76] : memref<16x128xf32, #tpu.memory_space<vmem>>, vector<16x128xf32>
    tpu.vector_store %arg4[%c0_75, %c0_76], %176 {strides = array<i32>} : memref<16x128xf32, #tpu.memory_space<vmem>>, vector<16x128xf32>,
    return
  }
}

</mosaic_0001>

<bundles_post_ra>
// kernel: tpu_custom_call.1
= control target key start
LH: loop header
LB: loop body
LE: loop exit
PB: predicated region body
PF: predicated region fallthrough
CT: control target
= control target key end

     0   :  { %9 = vsyncpa [#allocation5], 0  ;;  %s1346_s0 = inlined_call_operand.vmem [shape: f32[16,6], index: 0, kind: input, shape index: {}]   ;;  %s1347_s1 = inlined_call_operand.vmem [shape: s8[16,16], index: 1, kind: input, shape index: {}]   ;;  %s1348_s2 = inlined_call_operand.hbm [shape: bf16[240,128], index: 2, kind: input, shape index: {}]   ;;  %s1349_s3 = inlined_call_operand.hbm [shape: f32[64,128], index: 3, kind: input, shape index: {}]   ;;  %s1350_s4 = inlined_call_operand.hbm [shape: f32[16,128], index: 4, kind: output, shape index: {}]  }
   0x1   :  { %10 = vsyncpa [#allocation8], 0 }
   0x2   :  { %11 = vsyncpa [#allocation6], 0  ;;  %s20_s17 = sshll.u32 %s1348_s2, 4  ;;  %s1118_s18 = smov [#allocation4]   ;;  %s21_s17 = int_to_ptr.hbm [resolvable:$true] %s20_s17 }
   0x3   :  { %s22_s19 = sshll.u32 %s1118_s18, 4  ;;  %s33_s22 = sshll.u32 %s1349_s3, 4  ;;  %s23_s19 = int_to_ptr.vmem [resolvable:$true] %s22_s19  ;;  %s34_s22 = int_to_ptr.hbm [resolvable:$true] %s33_s22 }
   0x4   :  { %s1119_s23 = smov 64   ;;  %s1120_s24 = smov 4  }
   0x5   :  { %28 = dma.hbm_to_vmem [thread:$0]  %s21_s17, 1920, %s23_s19, [#allocation5], %s1119_s23, %s1119_s23, %s1120_s24  }
   0x6   :  { %s1121_s25 = smov [#allocation7]   ;;  %s1122_s27 = smov 128  }
   0x7   :  { %s35_s26 = sshll.u32 %s1121_s25, 4  ;;  %s1123_s28 = smov 8   ;;  %s36_s26 = int_to_ptr.vmem [resolvable:$true] %s35_s26 }
   0x8   :  { %41 = dma.hbm_to_vmem [thread:$0]  %s34_s22, 1024, %s36_s26, [#allocation8], %s1122_s27, %s1122_s27, %s1123_s28  }
   0x9   :  { %1112 = dma.done.wait [#allocation5], 1920  }
   0xa   :  { %1113 = vsyncadd [#allocation5], 4294965376 }
   0xb   :  { %1114 = dma.done.wait [#allocation8], 1024  }
   0xc   :  { %1115 = vsyncadd [#allocation8], 4294966272  ;;  %vm114_vm0 = vcmask 1042432   ;;  %v51_v0 = vld [vmem:[#allocation4] sm:$0x7]  ;;  %v107_v1 = vld [vmem:[%s1346_s0] sm:$0xff]  ;;  %v88_v22 = vlaneseq }
   0xd   :  { %v108_v2 = vld [vmem:[%s1346_s0 + $0x8] sm:$0xff]  ;;  %v116_v3 = vsel %vm114_vm0, %v51_v0, 0  ;;  %vm110_vm1 = vcmask 48128   ;;  %v1124_v6 = vmov 0   ;;  %vm185_vm2 = vcmask 257024   ;;  %s1130_s6 = smov 16  }
   0xe   :  { %v109_v4 = vpack.c.bf16 %v108_v2, %v107_v1  ;;  %v81_v5 = vld [vmem:[#allocation7 + $0x8] sm:$0xf]  ;;  %125 = vmatpush.bf16.msra.mxu0 %v116_v3  ;;  %177 = vst [vmem:[#allocation3] sm:$0xf] %v1124_v6  ;;  %vm263_vm3 = vcmask 519424   ;;  %vm346_vm4 = vcmask 781824  }
   0xf   :  { %167 = vmatpush.xpose.msra.mxu2 %v81_v5  ;;  %179 = vst [vmem:[#allocation3 + $0x8] sm:$0xf] %v1124_v6  ;;  %vm429_vm5 = vcmask 1044224   ;;  %v1125_v9 = vmov 3   ;;  %v1126_v10 = vmov 2   ;;  %v1127_v11 = vmov 1  }
  0x10   :  { %181 = vst [vmem:[#allocation3 + $0x10] sm:$0xf] %v1124_v6  ;;  %987 = vset.pattern.permute.xlu2 %v1125_v9  ;;  %986 = vset.pattern.permute.xlu1 %v1126_v10  ;;  %v80_v14 = vld [vmem:[#allocation7] sm:$0xf]  ;;  %v89_v25 = vshrl.u32 %v88_v22, 7  ;;  %v92_v26 = vand.u32 127, %v88_v22 }
  0x11   :  { %861 = vmatmul.msk.bf16.vlgmr.msra.gmra.mxu0 %vm110_vm1, %v109_v4  ;;  %183 = vst [vmem:[#allocation3 + $0x18] sm:$0xf] %v1124_v6  ;;  %985 = vset.pattern.permute.xlu0 %v1127_v11  ;;  %v967_v21 = vld [vmem:[%s1347_s1] sm:$0xf]   ;;  %v1128_v43 = vmov -1e+09  }
  0x12   :  { %178 = vst [vmem:[#allocation3 + $0x4] sm:$0xf] %v1124_v6  ;;  %v968_v23 = vunpack.c.0.s8 %v967_v21  ;;  %vm101_vm7 = vcmp.eq.s32.totalorder %v89_v25, %v92_v26  ;;  %v969_v32 = vunpack.c.1.s8 %v967_v21  ;;  %v90_v38 = vadd.s32 8, %v89_v25  ;;  %s1129_s1 = smov 32   ;;  %s1131_s7 = smov 48  }
  0x13   :  { %180 = vst [vmem:[#allocation3 + $0xc] sm:$0xf] %v1124_v6  ;;  %vm207_vm9 = vcmask 130048   ;;  %s1132_s8 = smov [#allocation9]   ;;  %s847_s12 = sshll.u32 %s1350_s4, 4  ;;  %s848_s12 = int_to_ptr.hbm [resolvable:$true] %s847_s12 }
  0x14   :  { %182 = vst [vmem:[#allocation3 + $0x14] sm:$0xf] %v1124_v6  ;;  %v97_v27 = vcvt.s32.f32 %v968_v23  ;;  %v98_v39 = vcvt.s32.f32 %v969_v32  ;;  %vm102_vm11 = vcmp.eq.s32.totalorder %v90_v38, %v92_v26  ;;  %s845_s9 = sshll.u32 %s1132_s8, 4  ;;  %s846_s9 = int_to_ptr.vmem [resolvable:$true] %s845_s9 }
  0x15   :  { %184 = vst [vmem:[#allocation3 + $0x1c] sm:$0xf] %v1124_v6 }
  0x16   :  { %vm99_vm6 = vcmp.gt.f32.partialorder %v97_v27, 0.0  ;;  %vm100_vm10 = vcmp.gt.f32.partialorder %v98_v39, 0.0 }
  0x17   :  { %vm103_vm8 = vmor %vm99_vm6, %vm101_vm7 }
  0x18   :  { %v1184_v44 = vsel %vm103_vm8, 0.0, %v1128_v43  ;;  %vm104_vm12 = vmor %vm100_vm10, %vm102_vm11 }
  0x19   :  { %v1190_v62 = vsel %vm104_vm12, 0.0, %v1128_v43 }
  0x8e   :  { %v127_v7 = vpop.f32.mrf.mxu0 }
  0x8f   :  { %v175_v8 = vpack.c.bf16 %v127_v7, %v127_v7  ;;  %168 = vmatmul.f32.vlgmr.msra.gmra.mxu2 %v127_v7 }
  0x91   :  { %186 = vst.msk [vmem:[#allocation3] sm:$0xf] %vm185_vm2, %v175_v8 }
  0x92   :  { %264 = vst.msk [vmem:[#allocation3 + $0x8] sm:$0xf] %vm263_vm3, %v175_v8 }
  0x93   :  { %347 = vst.msk [vmem:[#allocation3 + $0x10] sm:$0xf] %vm346_vm4, %v175_v8 }
  0x94   :  { %430 = vst.msk [vmem:[#allocation3 + $0x18] sm:$0xf] %vm429_vm5, %v175_v8 }
  0x96   :  { %v129_v12 = vpop.f32.mrf.mxu0 }
  0x97   :  { %v176_v13 = vpack.c.bf16 %v129_v12, %v129_v12  ;;  %146 = vmatpush.xpose.msra.mxu1 %v129_v12  ;;  %171 = vmatmul.f32.gmra.mxu2 %v129_v12 }
  0x99   :  { %187 = vst.msk [vmem:[#allocation3 + $0x4] sm:$0xf] %vm185_vm2, %v176_v13 }
  0x9a   :  { %265 = vst.msk [vmem:[#allocation3 + $0xc] sm:$0xf] %vm263_vm3, %v176_v13 }
  0x9b   :  { %348 = vst.msk [vmem:[#allocation3 + $0x14] sm:$0xf] %vm346_vm4, %v176_v13  ;;  %147 = vmatpush.xpose.msra.mxu1 %v127_v7 }
  0x9c   :  { %431 = vst.msk [vmem:[#allocation3 + $0x1c] sm:$0xf] %vm429_vm5, %v176_v13 }
  0x9e   :  { %148 = vmatmul.f32.vlgmr.msra.gmra.mxu1 %v80_v14 }
  0xa0   :  { %v962_v18 = vld [vmem:[#allocation3] sm:$0xff] }
  0xa1   :  { %v963_v17 = vld [vmem:[#allocation3 + $0x8] sm:$0xff] }
  0xa2   :  { %v964_v16 = vld [vmem:[#allocation3 + $0x10] sm:$0xff] }
  0xa3   :  { %v965_v15 = vld [vmem:[#allocation3 + $0x18] sm:$0xff] }
  0xa4   :  { %560 = vmatpush.bf16.msra.mxu3 %v965_v15 }
  0xa8   :  { %561 = vmatpush.bf16.msra.mxu3 %v964_v16 }
  0xac   :  { %562 = vmatpush.bf16.msra.mxu3 %v963_v17 }
  0xb0   :  { %563 = vmatpush.bf16.msra.mxu3 %v962_v18 }
 0x112   :  { %v169_v19 = vpop.f32.mrf.mxu2 }
 0x113   :  { %433 = vperm.xlu2 %987, %v169_v19   ;;  %350 = vperm.xlu1 %986, %v169_v19  }
 0x114   :  { %267 = vperm.xlu0 %985, %v169_v19  }
 0x11a   :  { %v172_v20 = vpop.f32.mrf.mxu2 }
 0x11b   :  { %437 = vperm.xlu2 %987, %v172_v20   ;;  %354 = vperm.xlu1 %986, %v172_v20   ;;  %v149_v24 = vpop.f32.mrf.mxu1 }
 0x11c   :  { %271 = vperm.xlu0 %985, %v172_v20   ;;  %v357_v29 = vperm.slane %v149_v24, 2  ;;  %v274_v30 = vperm.slane %v149_v24, 1  ;;  %v440_v41 = vperm.slane %v149_v24, 3  ;;  %v198_v0 = vperm.slane %v149_v24, 0 }
 0x123   :  { %989 = vset.pattern.permute.xlu1 %v1124_v6 }
 0x124   :  { %988 = vset.pattern.permute.xlu0 %v1124_v6  ;;  %195 = vperm.xlu1 %989, %v172_v20  }
 0x125   :  { %190 = vperm.xlu0 %988, %v169_v19  }
 0x12d   :  { %990 = vset.pattern.permute.xlu0 %v1125_v9 }
 0x16d   :  { %v434_v28 = vpop.permute.xlu2 %433 }
 0x16e   :  { %v441_v52 = vadd.f32 %v440_v41, %v434_v28 }
 0x170   :  { %v443_v59 = vmul.f32 0.2, %v441_v52 }
 0x172   :  { %v445_v4 = vmax.f32 %v441_v52, %v443_v59 }
 0x174   :  { %v447_v14 = vadd.f32 %v445_v4, %v1184_v44 }
 0x175   :  { %v438_v45 = vpop.permute.xlu2 %437 }
 0x176   :  { %v442_v53 = vadd.f32 %v440_v41, %v438_v45  ;;  %v449_v18 = vsel %vm207_vm9, %v447_v14, -inf }
 0x178   :  { %v444_v60 = vmul.f32 0.2, %v442_v53 }
 0x17a   :  { %v446_v5 = vmax.f32 %v442_v53, %v444_v60 }
 0x17c   :  { %v448_v13 = vadd.f32 %v446_v5, %v1190_v62 }
 0x17e   :  { %v452_v17 = vsel %vm207_vm9, %v448_v13, -inf }
 0x185   :  { %v351_v31 = vpop.permute.xlu1 %350 }
 0x186   :  { %v358_v33 = vadd.f32 %v357_v29, %v351_v31  ;;  %v268_v34 = vpop.permute.xlu0 %267 }
 0x187   :  { %v275_v35 = vadd.f32 %v274_v30, %v268_v34 }
 0x188   :  { %v360_v36 = vmul.f32 0.2, %v358_v33 }
 0x189   :  { %v277_v37 = vmul.f32 0.2, %v275_v35 }
 0x18a   :  { %v362_v40 = vmax.f32 %v358_v33, %v360_v36 }
 0x18b   :  { %v279_v42 = vmax.f32 %v275_v35, %v277_v37 }
 0x18c   :  { %v364_v46 = vadd.f32 %v362_v40, %v1184_v44 }
 0x18d   :  { %v355_v47 = vpop.permute.xlu1 %354  ;;  %v281_v48 = vadd.f32 %v279_v42, %v1184_v44 }
 0x18e   :  { %v359_v49 = vadd.f32 %v357_v29, %v355_v47  ;;  %v272_v50 = vpop.permute.xlu0 %271  ;;  %v366_v51 = vsel %vm207_vm9, %v364_v46, -inf }
 0x18f   :  { %v276_v54 = vadd.f32 %v274_v30, %v272_v50  ;;  %367 = vmax.xlane.f32.xlu0 %v366_v51  ;;  %v283_v55 = vsel %vm207_vm9, %v281_v48, -inf }
 0x190   :  { %v361_v56 = vmul.f32 0.2, %v359_v49  ;;  %284 = vmax.xlane.f32.xlu2 %v283_v55 }
 0x191   :  { %v278_v57 = vmul.f32 0.2, %v276_v54 }
 0x192   :  { %v363_v58 = vmax.f32 %v359_v49, %v361_v56 }
 0x193   :  { %v280_v61 = vmax.f32 %v276_v54, %v278_v57 }
 0x194   :  { %v365_v63 = vadd.f32 %v363_v58, %v1190_v62 }
 0x195   :  { %v282_v1 = vadd.f32 %v280_v61, %v1190_v62 }
 0x196   :  { %v196_v2 = vpop.permute.xlu1 %195  ;;  %v369_v3 = vsel %vm207_vm9, %v365_v63, -inf }
 0x197   :  { %v200_v6 = vadd.f32 %v198_v0, %v196_v2  ;;  %v191_v7 = vpop.permute.xlu0 %190  ;;  %v286_v8 = vsel %vm207_vm9, %v282_v1, -inf }
 0x198   :  { %v199_v9 = vadd.f32 %v198_v0, %v191_v7  ;;  %287 = vmax.xlane.f32.xlu1 %v286_v8  ;;  %370 = vmax.xlane.f32.xlu2 %v369_v3 }
 0x199   :  { %v202_v10 = vmul.f32 0.2, %v200_v6 }
 0x19a   :  { %v201_v12 = vmul.f32 0.2, %v199_v9 }
 0x19b   :  { %v204_v11 = vmax.f32 %v200_v6, %v202_v10 }
 0x19c   :  { %v203_v16 = vmax.f32 %v199_v9, %v201_v12 }
 0x19d   :  { %v206_v15 = vadd.f32 %v204_v11, %v1190_v62 }
 0x19e   :  { %v205_v20 = vadd.f32 %v203_v16, %v1184_v44 }
 0x19f   :  { %v211_v19 = vsel %vm207_vm9, %v206_v15, -inf }
 0x1a0   :  { %453 = vmax.xlane.f32.xlu1 %v452_v17  ;;  %450 = vmax.xlane.f32.xlu2 %v449_v18  ;;  %v208_v21 = vsel %vm207_vm9, %v205_v20, -inf }
 0x1a1   :  { %212 = vmax.xlane.f32.xlu0 %v211_v19 }
 0x1a8   :  { %209 = vmax.xlane.f32.xlu2 %v208_v21 }
 0x202   :  { %v368_v22 = vpop.xlane.xlu0 %367 }
 0x203   :  { %v372_v23 = vsub.f32 %v364_v46, %v368_v22  ;;  %v285_v24 = vpop.xlane.xlu2 %284 }
 0x204   :  { %v289_v25 = vsub.f32 %v281_v48, %v285_v24 }
 0x205   :  { %v374_v26 = vmul.f32 1.442695, %v372_v23 }
 0x206   :  { %v291_v27 = vmul.f32 1.442695, %v289_v25 }
 0x207   :  { %996 = vpow2.f32 %v374_v26 }
 0x208   :  { %998 = vpow2.f32 %v291_v27 }
 0x20b   :  { %v288_v28 = vpop.xlane.xlu1 %287  ;;  %v371_v29 = vpop.xlane.xlu2 %370 }
 0x20c   :  { %v290_v30 = vsub.f32 %v282_v1, %v288_v28  ;;  %v373_v31 = vsub.f32 %v365_v63, %v371_v29 }
 0x20d   :  { %v1204_v32 = vpop.eup %996 }
 0x20e   :  { %v1206_v33 = vpop.eup %998  ;;  %v293_v34 = vmul.f32 1.442695, %v290_v30  ;;  %v376_v35 = vmul.f32 1.442695, %v373_v31  ;;  %v378_v36 = vsel %vm207_vm9, %v1204_v32, 0.0 }
 0x20f   :  { %v295_v37 = vsel %vm207_vm9, %v1206_v33, 0.0  ;;  %379 = vadd.xlane.f32.xlu0 %v378_v36 }
 0x210   :  { %1000 = vpow2.f32 %v293_v34  ;;  %296 = vadd.xlane.f32.xlu1 %v295_v37 }
 0x211   :  { %1002 = vpow2.f32 %v376_v35 }
 0x213   :  { %v454_v38 = vpop.xlane.xlu1 %453  ;;  %v451_v39 = vpop.xlane.xlu2 %450 }
 0x214   :  { %v456_v40 = vsub.f32 %v448_v13, %v454_v38  ;;  %v455_v41 = vsub.f32 %v447_v14, %v451_v39  ;;  %v213_v42 = vpop.xlane.xlu0 %212 }
 0x215   :  { %v215_v48 = vsub.f32 %v206_v15, %v213_v42 }
 0x216   :  { %v1212_v43 = vpop.eup %1000  ;;  %v459_v45 = vmul.f32 1.442695, %v456_v40  ;;  %v457_v46 = vmul.f32 1.442695, %v455_v41 }
 0x217   :  { %v1214_v47 = vpop.eup %1002  ;;  %v298_v49 = vsel %vm207_vm9, %v1212_v43, 0.0  ;;  %v218_v51 = vmul.f32 1.442695, %v215_v48 }
 0x218   :  { %1004 = vpow2.f32 %v459_v45  ;;  %v381_v50 = vsel %vm207_vm9, %v1214_v47, 0.0  ;;  %299 = vadd.xlane.f32.xlu2 %v298_v49 }
 0x219   :  { %1006 = vpow2.f32 %v457_v46  ;;  %382 = vadd.xlane.f32.xlu1 %v381_v50 }
 0x21a   :  { %1008 = vpow2.f32 %v218_v51 }
 0x21b   :  { %v210_v52 = vpop.xlane.xlu2 %209 }
 0x21c   :  { %v214_v53 = vsub.f32 %v205_v20, %v210_v52 }
 0x21e   :  { %v1220_v54 = vpop.eup %1004  ;;  %v216_v55 = vmul.f32 1.442695, %v214_v53 }
 0x21f   :  { %v1222_v56 = vpop.eup %1006  ;;  %v464_v57 = vsel %vm207_vm9, %v1220_v54, 0.0 }
 0x220   :  { %1010 = vpow2.f32 %v216_v55  ;;  %465 = vadd.xlane.f32.xlu0 %v464_v57  ;;  %v461_v58 = vsel %vm207_vm9, %v1222_v56, 0.0  ;;  %v1228_v59 = vpop.eup %1008 }
 0x221   :  { %462 = vadd.xlane.f32.xlu2 %v461_v58  ;;  %v223_v63 = vsel %vm207_vm9, %v1228_v59, 0.0 }
 0x226   :  { %v1230_v60 = vpop.eup %1010 }
 0x227   :  { %v220_v61 = vsel %vm207_vm9, %v1230_v60, 0.0 }
 0x228   :  { %221 = vadd.xlane.f32.xlu1 %v220_v61 }
 0x229   :  { %224 = vadd.xlane.f32.xlu2 %v223_v63  ;;  %v951_v63 = vld [vmem:[#allocation4 + $0x28] sm:$0xff] }
 0x282   :  { %v380_v0 = vpop.xlane.xlu0 %379 }
 0x283   :  { %v297_v1 = vpop.xlane.xlu1 %296  ;;  %1012 = vrcp.f32 %v380_v0  ;;  %v395_v10 = vand.u32 2147483648, %v380_v0  ;;  %v393_v12 = vand.u32 2147483647, %v380_v0  ;;  %vm389_vm15 = vweird.f32 %v380_v0 }
 0x284   :  { %1014 = vrcp.f32 %v297_v1  ;;  %v312_v14 = vand.u32 2147483648, %v297_v1  ;;  %vm306_vm0 = vweird.f32 %v297_v1  ;;  %v310_v18 = vand.u32 2147483647, %v297_v1 }
 0x285   :  { %v396_v16 = vor.u32 1.1754944e-38, %v395_v10  ;;  %vm394_vm3 = vcmp.eq.f32.partialorder %v393_v12, 8.507059e+37 }
 0x286   :  { %v313_v27 = vor.u32 1.1754944e-38, %v312_v14  ;;  %vm311_vm4 = vcmp.eq.f32.partialorder %v310_v18, 8.507059e+37 }
 0x289   :  { %v1013_v2 = vpop.eup %1012 }
 0x28a   :  { %v1015_v3 = vpop.eup %1014  ;;  %v385_v4 = vmul.f32 %v1013_v2, %v380_v0  ;;  %vm390_vm13 = vweird.f32 %v1013_v2 }
 0x28b   :  { %v302_v5 = vmul.f32 %v1015_v3, %v297_v1  ;;  %v1236_v6 = vpop.xlane.xlu2 %299  ;;  %vm307_vm14 = vweird.f32 %v1015_v3  ;;  %vm391_vm1 = vmor %vm389_vm15, %vm390_vm13 }
 0x28c   :  { %v386_v7 = vsub.f32 1.0, %v385_v4  ;;  %v1238_v8 = vpop.xlane.xlu1 %382  ;;  %1016 = vrcp.f32 %v1236_v6  ;;  %vm1244_vm2 = vmor %vm306_vm0, %vm307_vm14  ;;  %v327_v40 = vand.u32 2147483648, %v1236_v6  ;;  %v325_v46 = vand.u32 2147483647, %v1236_v6 }
 0x28d   :  { %v303_v9 = vsub.f32 1.0, %v302_v5  ;;  %1018 = vrcp.f32 %v1238_v8  ;;  %v410_v39 = vand.u32 2147483648, %v1238_v8  ;;  %v408_v45 = vand.u32 2147483647, %v1238_v8 }
 0x28e   :  { %v387_v11 = vmul.f32 %v1013_v2, %v386_v7  ;;  %vm321_vm5 = vweird.f32 %v1236_v6  ;;  %vm404_vm7 = vweird.f32 %v1238_v8  ;;  %v328_v53 = vor.u32 1.1754944e-38, %v327_v40 }
 0x28f   :  { %v304_v13 = vmul.f32 %v1015_v3, %v303_v9  ;;  %v411_v52 = vor.u32 1.1754944e-38, %v410_v39  ;;  %vm409_vm11 = vcmp.eq.f32.partialorder %v408_v45, 8.507059e+37  ;;  %vm1288_vm12 = vcmp.eq.f32.partialorder %v325_v46, 8.507059e+37 }
 0x290   :  { %v388_v15 = vadd.f32 %v1013_v2, %v387_v11 }
 0x291   :  { %v305_v17 = vadd.f32 %v1015_v3, %v304_v13 }
 0x292   :  { %v1242_v19 = vpop.eup %1016  ;;  %v392_v21 = vsel %vm391_vm1, %v1013_v2, %v388_v15 }
 0x293   :  { %v1019_v22 = vpop.eup %1018  ;;  %v317_v23 = vmul.f32 %v1242_v19, %v1236_v6  ;;  %v1250_v24 = vpop.xlane.xlu0 %465  ;;  %v309_v25 = vsel %vm1244_vm2, %v1015_v3, %v305_v17  ;;  %v397_v26 = vsel %vm394_vm3, %v396_v16, %v392_v21  ;;  %vm322_vm6 = vweird.f32 %v1242_v19 }
 0x294   :  { %v400_v28 = vmul.f32 %v1019_v22, %v1238_v8  ;;  %1020 = vrcp.f32 %v1250_v24  ;;  %v1256_v29 = vpop.xlane.xlu2 %462  ;;  %v314_v34 = vsel %vm311_vm4, %v313_v27, %v309_v25  ;;  %v414_v35 = vmul.f32 %v1204_v32, %v397_v26  ;;  %vm1283_vm10 = vmor %vm321_vm5, %vm322_vm6 }
 0x295   :  { %v318_v30 = vsub.f32 1.0, %v317_v23  ;;  %1022 = vrcp.f32 %v1256_v29  ;;  %v331_v37 = vmul.f32 %v1206_v33, %v314_v34  ;;  %vm405_vm8 = vweird.f32 %v1019_v22 }
 0x296   :  { %v401_v31 = vsub.f32 1.0, %v400_v28  ;;  %v416_v41 = vpack.c.bf16 %v414_v35, %v414_v35  ;;  %vm406_vm13 = vmor %vm404_vm7, %vm405_vm8  ;;  %vm487_vm14 = vweird.f32 %v1250_v24  ;;  %v493_v0 = vand.u32 2147483648, %v1250_v24 }
 0x297   :  { %v319_v36 = vmul.f32 %v1242_v19, %v318_v30  ;;  %v333_v42 = vpack.c.bf16 %v331_v37, %v331_v37  ;;  %v491_v5 = vand.u32 2147483647, %v1250_v24  ;;  %v478_v7 = vand.u32 2147483648, %v1256_v29 }
 0x298   :  { %v402_v38 = vmul.f32 %v1019_v22, %v401_v31  ;;  %420 = vrot.lane.b32.xlu2 %v416_v41, %s1129_s1  ;;  %v476_v8 = vand.u32 2147483647, %v1256_v29  ;;  %v494_v14 = vor.u32 1.1754944e-38, %v493_v0  ;;  %vm472_vm2 = vweird.f32 %v1256_v29  ;;  %v950_v0 = vld [vmem:[#allocation4 + $0x20] sm:$0xff] }
 0x299   :  { %v320_v32 = vadd.f32 %v1242_v19, %v319_v36  ;;  %337 = vrot.lane.b32.xlu0 %v333_v42, %s1130_s6  ;;  %vm492_vm3 = vcmp.eq.f32.partialorder %v491_v5, 8.507059e+37 }
 0x29a   :  { %v1021_v48 = vpop.eup %1020  ;;  %v403_v51 = vadd.f32 %v1019_v22, %v402_v38  ;;  %vm477_vm5 = vcmp.eq.f32.partialorder %v476_v8, 8.507059e+37 }
 0x29b   :  { %v1023_v33 = vpop.eup %1022  ;;  %v483_v49 = vmul.f32 %v1021_v48, %v1250_v24  ;;  %v1273_v50 = vpop.xlane.xlu1 %221  ;;  %v324_v2 = vsel %vm1283_vm10, %v1242_v19, %v320_v32  ;;  %vm488_vm15 = vweird.f32 %v1021_v48 }
 0x29c   :  { %v468_v55 = vmul.f32 %v1023_v33, %v1256_v29  ;;  %1024 = vrcp.f32 %v1273_v50  ;;  %v1277_v57 = vpop.xlane.xlu2 %224  ;;  %v407_v4 = vsel %vm406_vm13, %v1019_v22, %v403_v51  ;;  %vm473_vm0 = vweird.f32 %v1023_v33  ;;  %vm489_vm1 = vmor %vm487_vm14, %vm488_vm15  ;;  %v953_v51 = vld [vmem:[#allocation4 + $0x38] sm:$0xff] }
 0x29d   :  { %v484_v61 = vsub.f32 1.0, %v483_v49  ;;  %1026 = vrcp.f32 %v1277_v57  ;;  %v412_v9 = vsel %vm409_vm11, %v411_v52, %v407_v4  ;;  %v329_v11 = vsel %vm1288_vm12, %v328_v53, %v324_v2  ;;  %vm474_vm4 = vmor %vm472_vm2, %vm473_vm0  ;;  %v948_v2 = vld [vmem:[#allocation4 + $0x10] sm:$0xff]  ;;  %v991_v4 = vld [vmem:[#allocation7 + $0x10] ss:$0 sm:$0xff] }
 0x29e   :  { %v469_v1 = vsub.f32 1.0, %v468_v55  ;;  %v415_v10 = vmul.f32 %v1214_v47, %v412_v9  ;;  %v332_v15 = vmul.f32 %v1212_v43, %v329_v11  ;;  %v479_v47 = vor.u32 1.1754944e-38, %v478_v7 }
 0x29f   :  { %v485_v3 = vmul.f32 %v1021_v48, %v484_v61  ;;  %v235_v26 = vand.u32 2147483647, %v1273_v50  ;;  %v237_v27 = vand.u32 2147483648, %v1273_v50  ;;  %v252_v31 = vand.u32 2147483648, %v1277_v57  ;;  %v952_v61 = vld [vmem:[#allocation4 + $0x30] sm:$0xff] }
 0x2a0   :  { %v470_v6 = vmul.f32 %v1023_v33, %v469_v1  ;;  %v417_v19 = vpack.c.bf16 %v415_v10, %v415_v10  ;;  %v334_v22 = vpack.c.bf16 %v332_v15, %v332_v15  ;;  %vm231_vm8 = vweird.f32 %v1273_v50  ;;  %v949_v1 = vld [vmem:[#allocation4 + $0x18] sm:$0xff] }
 0x2a1   :  { %v486_v12 = vadd.f32 %v1021_v48, %v485_v3  ;;  %v238_v38 = vor.u32 1.1754944e-38, %v237_v27  ;;  %vm246_vm11 = vweird.f32 %v1277_v57  ;;  %vm236_vm12 = vcmp.eq.f32.partialorder %v235_v26, 8.507059e+37  ;;  %v947_v3 = vld [vmem:[#allocation4 + $0x8] sm:$0xff] }
 0x2a2   :  { %v1025_v13 = vpop.eup %1024  ;;  %v471_v16 = vadd.f32 %v1023_v33, %v470_v6  ;;  %422 = vrot.lane.b32.xlu0 %v417_v19, %s1129_s1  ;;  %339 = vrot.lane.b32.xlu1 %v334_v22, %s1130_s6  ;;  %v253_v42 = vor.u32 1.1754944e-38, %v252_v31  ;;  %vm260_vm15 = vcmask 125952   ;;  %vm343_vm0 = vcmask 257152  }
 0x2a3   :  { %v1027_v17 = vpop.eup %1026  ;;  %v227_v18 = vmul.f32 %v1025_v13, %v1273_v50  ;;  %v490_v20 = vsel %vm489_vm1, %v1021_v48, %v486_v12  ;;  %vm232_vm6 = vweird.f32 %v1025_v13  ;;  %v954_v50 = vld [vmem:[#allocation4 + $0x40] sm:$0xff]  ;;  %vm426_vm1 = vcmask 388352  }
 0x2a4   :  { %v242_v21 = vmul.f32 %v1027_v17, %v1277_v57  ;;  %v495_v23 = vsel %vm492_vm3, %v494_v14, %v490_v20  ;;  %v475_v43 = vsel %vm474_vm4, %v1023_v33, %v471_v16  ;;  %vm247_vm7 = vweird.f32 %v1027_v17  ;;  %vm233_vm10 = vmor %vm231_vm8, %vm232_vm6  ;;  %629 = vmatpush.bf16.msrb.mxu0 %v954_v50 }
 0x2a5   :  { %v228_v24 = vsub.f32 1.0, %v227_v18  ;;  %v498_v25 = vmul.f32 %v1220_v54, %v495_v23  ;;  %v480_v29 = vsel %vm477_vm5, %v479_v47, %v475_v43  ;;  %v250_v54 = vand.u32 2147483647, %v1277_v57  ;;  %vm248_vm13 = vmor %vm246_vm11, %vm247_vm7  ;;  %v992_v18 = vld [vmem:[#allocation7 + $0x20] ss:$0 sm:$0xff] }
 0x2a6   :  { %v243_v28 = vsub.f32 1.0, %v242_v21  ;;  %v497_v34 = vmul.f32 %v1222_v56, %v480_v29  ;;  %vm509_vm2 = vcmask 519552   ;;  %vm552_vm3 = vcmask 523264  }
 0x2a7   :  { %v229_v30 = vmul.f32 %v1025_v13, %v228_v24  ;;  %v500_v37 = vpack.c.bf16 %v498_v25, %v498_v25  ;;  %vm251_vm14 = vcmp.eq.f32.partialorder %v250_v54, 8.507059e+37  ;;  %vm643_vm6 = vcmask 261120   ;;  %v83_v25 = vld [vmem:[#allocation7 + $0x18] sm:$0x1] }
 0x2a8   :  { %v244_v35 = vmul.f32 %v1027_v17, %v243_v28  ;;  %v499_v40 = vpack.c.bf16 %v497_v34, %v497_v34  ;;  %630 = vmatpush.bf16.msrb.mxu0 %v953_v51 }
 0x2a9   :  { %v230_v36 = vadd.f32 %v1025_v13, %v229_v30 }
 0x2aa   :  { %v245_v39 = vadd.f32 %v1027_v17, %v244_v35  ;;  %505 = vrot.lane.b32.xlu0 %v500_v37, %s1131_s7  ;;  %503 = vrot.lane.b32.xlu1 %v499_v40, %s1131_s7 }
 0x2ab   :  { %v234_v41 = vsel %vm233_vm10, %v1025_v13, %v230_v36 }
 0x2ac   :  { %v239_v45 = vsel %vm236_vm12, %v238_v38, %v234_v41  ;;  %v249_v56 = vsel %vm248_vm13, %v1027_v17, %v245_v39  ;;  %631 = vmatpush.bf16.msrb.mxu0 %v952_v61 }
 0x2ad   :  { %v256_v46 = vmul.f32 %v1230_v60, %v239_v45  ;;  %v254_v48 = vsel %vm251_vm14, %v253_v42, %v249_v56 }
 0x2ae   :  { %v257_v32 = vmul.f32 %v1228_v59, %v254_v48 }
 0x2af   :  { %v258_v33 = vpack.c.bf16 %v256_v46, %v256_v46 }
 0x2b0   :  { %v259_v49 = vpack.c.bf16 %v257_v32, %v257_v32  ;;  %632 = vmatpush.bf16.msrb.mxu0 %v951_v63 }
 0x2b1   :  { %261 = vst.msk [vmem:[#allocation2] sm:$0xf] %vm260_vm15, %v258_v33 }
 0x2b2   :  { %262 = vst.msk [vmem:[#allocation2 + $0x4] sm:$0xf] %vm260_vm15, %v259_v49 }
 0x2b4   :  { %633 = vmatpush.bf16.msrb.mxu0 %v950_v0 }
 0x2b8   :  { %634 = vmatpush.bf16.msrb.mxu0 %v949_v1 }
 0x2bc   :  { %635 = vmatpush.bf16.msrb.mxu0 %v948_v2 }
 0x2c0   :  { %636 = vmatpush.bf16.msrb.mxu0 %v947_v3 }
 0x2f2   :  { %v421_v53 = vpop.permute.xlu2 %420 }
 0x30b   :  { %v338_v52 = vpop.permute.xlu0 %337 }
 0x30c   :  { %344 = vst.msk [vmem:[#allocation2] sm:$0xf] %vm343_vm0, %v338_v52 }
 0x30d   :  { %427 = vst.msk [vmem:[#allocation2] sm:$0xf] %vm426_vm1, %v421_v53 }
 0x314   :  { %v423_v60 = vpop.permute.xlu0 %422  ;;  %v340_v55 = vpop.permute.xlu1 %339 }
 0x315   :  { %345 = vst.msk [vmem:[#allocation2 + $0x4] sm:$0xf] %vm343_vm0, %v340_v55 }
 0x316   :  { %428 = vst.msk [vmem:[#allocation2 + $0x4] sm:$0xf] %vm426_vm1, %v423_v60 }
 0x31c   :  { %v506_v59 = vpop.permute.xlu0 %505  ;;  %v504_v57 = vpop.permute.xlu1 %503 }
 0x31d   :  { %511 = vst.msk [vmem:[#allocation2 + $0x4] sm:$0xf] %vm509_vm2, %v506_v59 }
 0x31e   :  { %510 = vst.msk [vmem:[#allocation2] sm:$0xf] %vm509_vm2, %v504_v57 }
 0x325   :  { %v961_v58 = vld [vmem:[#allocation2] sm:$0xff] }
 0x326   :  { %882 = vmatmul.msk.bf16.vlgmr.msra.gmra.mxu3 %vm552_vm3, %v961_v58 }
 0x3a9   :  { %v565_v5 = vpop.f32.mrf.mxu3 }
 0x3aa   :  { %v566_v6 = vadd.f32 %v991_v4, %v565_v5 }
 0x3ac   :  { %v572_v7 = vmul.f32 1.442695, %v566_v6  ;;  %vm570_vm4 = vcmp.gt.f32.partialorder %v566_v6, 0.0 }
 0x3ae   :  { %1028 = vpow2.f32 %v572_v7 }
 0x3b1   :  { %v567_v9 = vpop.f32.mrf.mxu3 }
 0x3b2   :  { %v568_v8 = vadd.f32 %v991_v4, %v567_v9 }
 0x3b4   :  { %v574_v10 = vmul.f32 1.442695, %v568_v8  ;;  %v1029_v11 = vpop.eup %1028  ;;  %vm571_vm5 = vcmp.gt.f32.partialorder %v568_v8, 0.0 }
 0x3b5   :  { %v883_v12 = vadd.f32 -1.0, %v1029_v11 }
 0x3b6   :  { %1030 = vpow2.f32 %v574_v10 }
 0x3b7   :  { %v578_v15 = vsel %vm570_vm4, %v566_v6, %v883_v12  ;;  %v956_v12 = vld [vmem:[#allocation4 + $0x50] sm:$0xff] }
 0x3bc   :  { %v1031_v13 = vpop.eup %1030 }
 0x3bd   :  { %v884_v14 = vadd.f32 -1.0, %v1031_v13  ;;  %v955_v13 = vld [vmem:[#allocation4 + $0x48] sm:$0xff] }
 0x3bf   :  { %v579_v16 = vsel %vm571_vm5, %v568_v8, %v884_v14 }
 0x3c0   :  { %v580_v17 = vpack.c.bf16 %v579_v16, %v578_v15  ;;  %v993_v15 = vld [vmem:[#allocation7 + $0x28] ss:$0 sm:$0xff] }
 0x3c2   :  { %637 = vmatmul.bf16.vlgmr.msrb.gmra.mxu0 %v580_v17 }
 0x43f   :  { %v638_v19 = vpop.f32.mrf.mxu0 }
 0x440   :  { %v674_v20 = vmul.f32 %v992_v18, %v638_v19 }
 0x442   :  { %v676_v47 = vsel %vm643_vm6, %v674_v20, 0.0 }
 0x443   :  { %677 = vadd.xlane.f32.xlu2 %v676_v47 }
 0x447   :  { %v640_v21 = vpop.f32.mrf.mxu0 }
 0x448   :  { %v675_v22 = vmul.f32 %v992_v18, %v640_v21  ;;  %917 = vmatpush.xpose.msk.msrb.mxu1 %vm643_vm6, %v640_v21  ;;  %v742_v23 = vpack.c.bf16 %v640_v21, %v638_v19  ;;  %v960_v21 = vld [vmem:[#allocation4 + $0x70] sm:$0xff] }
 0x449   :  { %829 = vmatpush.bf16.msrb.mxu3 %v960_v21 }
 0x44a   :  { %754 = vmatpush.bf16.msrb.mxu2 %v742_v23  ;;  %v679_v24 = vsel %vm643_vm6, %v675_v22, 0.0  ;;  %v959_v22 = vld [vmem:[#allocation4 + $0x68] sm:$0xff]  ;;  %v958_v23 = vld [vmem:[#allocation4 + $0x60] sm:$0xff] }
 0x44b   :  { %680 = vadd.xlane.f32.xlu1 %v679_v24  ;;  %v957_v24 = vld [vmem:[#allocation4 + $0x58] sm:$0xff] }
 0x44c   :  { %918 = vmatpush.xpose.msk.msrb.mxu1 %vm643_vm6, %v638_v19 }
 0x44d   :  { %830 = vmatpush.bf16.msrb.mxu3 %v959_v22 }
 0x44f   :  { %919 = vmatmul.msk.f32.vlgmr.msrb.gmra.mxu1 %vm643_vm6, %v83_v25 }
 0x450   :  { %786 = vmatpush.bf16.msra.mxu1 %v956_v12 }
 0x451   :  { %831 = vmatpush.bf16.msrb.mxu3 %v958_v23 }
 0x454   :  { %787 = vmatpush.bf16.msra.mxu1 %v955_v13 }
 0x455   :  { %832 = vmatpush.bf16.msrb.mxu3 %v957_v24 }
 0x4b6   :  { %v678_v27 = vpop.xlane.xlu2 %677 }
 0x4be   :  { %v681_v28 = vpop.xlane.xlu1 %680 }
 0x4cc   :  { %v670_v43 = vpop.f32.mrf.mxu1 }
 0x4cd   :  { %v682_v26 = vperm.slane %v670_v43, 0  ;;  %v994_v43 = vld [vmem:[#allocation7 + $0x30] ss:$0 sm:$0xff] }
 0x4cf   :  { %v683_v29 = vadd.f32 %v682_v26, %v678_v27  ;;  %v684_v30 = vadd.f32 %v682_v26, %v681_v28 }
 0x4d1   :  { %v685_v31 = vmul.f32 0.2, %v683_v29  ;;  %v686_v34 = vmul.f32 0.2, %v684_v30 }
 0x4d3   :  { %v688_v35 = vmax.f32 %v684_v30, %v686_v34  ;;  %v687_v54 = vmax.f32 %v683_v29, %v685_v31  ;;  %v995_v34 = vld [vmem:[#allocation7 + $0x38] ss:$0 sm:$0xff] }
 0x4d5   :  { %v690_v36 = vadd.f32 %v688_v35, %v1190_v62  ;;  %v689_v37 = vadd.f32 %v687_v54, %v1184_v44 }
 0x4d7   :  { %v694_v38 = vsel %vm207_vm9, %v690_v36, -inf  ;;  %v691_v39 = vsel %vm207_vm9, %v689_v37, -inf }
 0x4d8   :  { %695 = vmax.xlane.f32.xlu2 %v694_v38  ;;  %692 = vmax.xlane.f32.xlu0 %v691_v39 }
 0x54b   :  { %v696_v40 = vpop.xlane.xlu2 %695  ;;  %v693_v41 = vpop.xlane.xlu0 %692 }
 0x54c   :  { %v698_v42 = vsub.f32 %v690_v36, %v696_v40  ;;  %v697_v45 = vsub.f32 %v689_v37, %v693_v41 }
 0x54e   :  { %v701_v56 = vmul.f32 1.442695, %v698_v42  ;;  %v699_v46 = vmul.f32 1.442695, %v697_v45 }
 0x550   :  { %1032 = vpow2.f32 %v701_v56 }
 0x551   :  { %1034 = vpow2.f32 %v699_v46 }
 0x556   :  { %v1033_v48 = vpop.eup %1032 }
 0x557   :  { %v1035_v32 = vpop.eup %1034  ;;  %v706_v62 = vsel %vm207_vm9, %v1033_v48, 0.0 }
 0x558   :  { %707 = vadd.xlane.f32.xlu0 %v706_v62  ;;  %v703_v44 = vsel %vm207_vm9, %v1035_v32, 0.0 }
 0x559   :  { %704 = vadd.xlane.f32.xlu1 %v703_v44 }
 0x5cb   :  { %v708_v33 = vpop.xlane.xlu0 %707 }
 0x5cc   :  { %v705_v49 = vpop.xlane.xlu1 %704  ;;  %1036 = vrcp.f32 %v708_v33  ;;  %v735_v59 = vand.u32 2147483648, %v708_v33  ;;  %v733_v61 = vand.u32 2147483647, %v708_v33  ;;  %vm729_vm10 = vweird.f32 %v708_v33 }
 0x5cd   :  { %1038 = vrcp.f32 %v705_v49  ;;  %v720_v57 = vand.u32 2147483648, %v705_v49  ;;  %v718_v0 = vand.u32 2147483647, %v705_v49  ;;  %vm714_vm11 = vweird.f32 %v705_v49 }
 0x5ce   :  { %v736_v3 = vor.u32 1.1754944e-38, %v735_v59  ;;  %vm734_vm14 = vcmp.eq.f32.partialorder %v733_v61, 8.507059e+37 }
 0x5cf   :  { %v721_v4 = vor.u32 1.1754944e-38, %v720_v57  ;;  %vm719_vm15 = vcmp.eq.f32.partialorder %v718_v0, 8.507059e+37 }
 0x5d2   :  { %v1037_v50 = vpop.eup %1036 }
 0x5d3   :  { %v1039_v51 = vpop.eup %1038  ;;  %v725_v52 = vmul.f32 %v1037_v50, %v708_v33  ;;  %vm730_vm7 = vweird.f32 %v1037_v50 }
 0x5d4   :  { %v710_v53 = vmul.f32 %v1039_v51, %v705_v49  ;;  %vm715_vm8 = vweird.f32 %v1039_v51  ;;  %vm731_vm12 = vmor %vm729_vm10, %vm730_vm7 }
 0x5d5   :  { %v726_v60 = vsub.f32 1.0, %v725_v52  ;;  %vm716_vm13 = vmor %vm714_vm11, %vm715_vm8 }
 0x5d6   :  { %v711_v55 = vsub.f32 1.0, %v710_v53 }
 0x5d7   :  { %v727_v58 = vmul.f32 %v1037_v50, %v726_v60 }
 0x5d8   :  { %v712_v63 = vmul.f32 %v1039_v51, %v711_v55 }
 0x5d9   :  { %v728_v1 = vadd.f32 %v1037_v50, %v727_v58 }
 0x5da   :  { %v713_v2 = vadd.f32 %v1039_v51, %v712_v63 }
 0x5db   :  { %v732_v5 = vsel %vm731_vm12, %v1037_v50, %v728_v1 }
 0x5dc   :  { %v717_v6 = vsel %vm716_vm13, %v1039_v51, %v713_v2  ;;  %v737_v7 = vsel %vm734_vm14, %v736_v3, %v732_v5 }
 0x5dd   :  { %v722_v9 = vsel %vm719_vm15, %v721_v4, %v717_v6  ;;  %v740_v8 = vmul.f32 %v1033_v48, %v737_v7 }
 0x5de   :  { %v739_v10 = vmul.f32 %v1035_v32, %v722_v9 }
 0x5e0   :  { %v741_v11 = vpack.c.bf16 %v740_v8, %v739_v10 }
 0x5e2   :  { %920 = vmatmul.msk.bf16.vlgmr.msrb.gmra.mxu2 %vm207_vm9, %v741_v11 }
 0x665   :  { %v756_v14 = vpop.f32.mrf.mxu2 }
 0x666   :  { %v757_v16 = vadd.f32 %v993_v15, %v756_v14 }
 0x668   :  { %v761_v19 = vmax.f32 %v757_v16, 0.0 }
 0x66d   :  { %v758_v17 = vpop.f32.mrf.mxu2 }
 0x66e   :  { %v759_v18 = vadd.f32 %v993_v15, %v758_v17 }
 0x670   :  { %v762_v20 = vmax.f32 %v759_v18, 0.0 }
 0x672   :  { %v763_v47 = vpack.c.bf16 %v762_v20, %v761_v19 }
 0x674   :  { %929 = vmatmul.msk.bf16.vlgmr.msra.gmra.mxu1 %vm643_vm6, %v763_v47 }
 0x6f1   :  { %v789_v25 = vpop.f32.mrf.mxu1 }
 0x6f2   :  { %v790_v26 = vadd.f32 %v994_v43, %v789_v25 }
 0x6f4   :  { %v794_v29 = vmax.f32 %v790_v26, 0.0 }
 0x6f9   :  { %v791_v27 = vpop.f32.mrf.mxu1 }
 0x6fa   :  { %v792_v28 = vadd.f32 %v994_v43, %v791_v27 }
 0x6fc   :  { %v795_v30 = vmax.f32 %v792_v28, 0.0 }
 0x6fe   :  { %v796_v31 = vpack.c.bf16 %v795_v30, %v794_v29 }
 0x700   :  { %946 = vmatmul.msk.bf16.vlgmr.msrb.gmra.mxu3 %vm552_vm3, %v796_v31 }
 0x783   :  { %v834_v35 = vpop.f32.mrf.mxu3 }
 0x784   :  { %v835_v54 = vadd.f32 %v995_v34, %v834_v35 }
 0x786   :  { %839 = vst [vmem:[#allocation9] sm:$0xff] %v835_v54 }
 0x78b   :  { %v836_v36 = vpop.f32.mrf.mxu3 }
 0x78c   :  { %v837_v37 = vadd.f32 %v995_v34, %v836_v36 }
 0x78e   :  { %840 = vst [vmem:[#allocation9 + $0x8] sm:$0xff] %v837_v37 }
 0x78f   :  { %853 = dma.vmem_to_hbm [thread:$0]  %s846_s9, 256, %s848_s12, [#allocation6], %s1122_s27, %s1122_s27, %s1123_s28  }
 0x790   :  { %1116 = dma.done.wait [#allocation6], 256  }
 0x791   :  { %1117 = vsyncadd [#allocation6], 4294967040 }
 0x792   :  { %858 = vsyncpa [#allocation5], 1 }
 0x793   :  { %859 = vsyncpa [#allocation8], 1 }
 0x794   :  { %860 = vsyncpa [#allocation6], 1 }

</bundles_post_ra>
